<compile_context>
chip_gen: v5e
topology: v5e:2x2
jax: 0.10.0
libtpu: 0.0.40
codegen_flags: <defaults>
</compile_context>

<pallas_src>
import functools

import jax
import jax.numpy as jnp
from jax.experimental import pallas as pl
from jax.experimental.pallas import tpu as pltpu

HIDDEN = 200          # matches nn.Linear(input_size, 200)
HIDDEN_PAD = 256      # lane-padded hidden width (multiple of 128)
ACTION_PAD = 128      # lane-padded output width (multiple of 128)

VMEM_TILE_BUDGET = 44 * 2**20   # working-set budget (safe inside v7x's 64 MiB)


def _round_up(x, m):
    return (x + m - 1) // m * m


def _is_v5e():
    try:
        kind = jax.devices()[0].device_kind.lower()
    except Exception:
        return False
    return ("v5 lite" in kind) or ("v5e" in kind) or ("v5litepod" in kind)


def _vmem_estimate(TB, K, x_bytes, out_bytes):
    x_buf = 2 * TB * K * x_bytes                          # double-buffered x tiles
    o_buf = 2 * TB * ACTION_PAD * out_bytes               # double-buffered out tiles
    w_res = ((K * HIDDEN_PAD + HIDDEN_PAD * ACTION_PAD) * 2
             + (HIDDEN_PAD + ACTION_PAD) * 4)             # resident weights/biases
    interm = TB * HIDDEN_PAD * 4 + TB * ACTION_PAD * 4    # f32 in-kernel temporaries
    return x_buf + o_buf + w_res + interm


def _choose_tile(B, block_batch, K, x_bytes, out_bytes):
    TB = min(block_batch, _round_up(B, 8))
    Bp = _round_up(B, TB)
    # >= 2 grid steps for large batches so v7x's two TensorCores both get work.
    if Bp // TB == 1 and Bp >= 256:
        TB = _round_up((Bp + 1) // 2, 8)
        Bp = _round_up(B, TB)
    # Shrink the tile until the (double-buffered) footprint fits the VMEM budget.
    while TB > 128 and _vmem_estimate(TB, K, x_bytes, out_bytes) > VMEM_TILE_BUDGET:
        TB = _round_up(max(TB // 2, 8), 8)
        Bp = _round_up(B, TB)
    return TB, Bp


def _resident_spec(shape, single_buffer):
    """BlockSpec for operands whose block never changes (constant index_map).

    Single-buffered to save VMEM; falls back to default buffering if this JAX
    build does not support pipeline_mode on BlockSpec.
    """
    if single_buffer:
        return pl.BlockSpec(shape, lambda i: (0, 0), pipeline_mode=pl.Buffered(1))
    return pl.BlockSpec(shape, lambda i: (0, 0))


def _mlp_kernel(x_ref, w1_ref, b1_ref, w2_ref, b2_ref, o_ref):
    # In-kernel cast keeps the HBM read of x to a single pass (no-op if the
    # tile already arrives as bf16).
    x = x_ref[...].astype(jnp.bfloat16)
    # fc1: (TB, K) @ (K, 256) on the MXU, bf16 inputs, f32 accumulate.
    h = jnp.dot(x, w1_ref[...], preferred_element_type=jnp.float32)
    h = jnp.maximum(h + b1_ref[...], 0.0)
    # output layer: (TB, 256) @ (256, 128); bias + sigmoid in f32.
    z = jnp.dot(h.astype(jnp.bfloat16), w2_ref[...],
                preferred_element_type=jnp.float32)
    o_ref[...] = jax.nn.sigmoid(z + b2_ref[...]).astype(o_ref.dtype)


@functools.partial(
    jax.jit,
    static_argnames=("block_batch", "out_dtype", "single_buffer_weights",
                     "precast_x_bf16"),
)
def _forward(x, w1, b1, w2, b2, *, block_batch, out_dtype,
             single_buffer_weights, precast_x_bf16):
    B, K = x.shape
    A = w2.shape[1]

    xk = x.astype(jnp.bfloat16) if precast_x_bf16 else x
    x_bytes = xk.dtype.itemsize
    out_bytes = jnp.dtype(out_dtype).itemsize

    TB, Bp = _choose_tile(B, block_batch, K, x_bytes, out_bytes)
    if Bp != B:                                # pad batch only when needed
        xk = jnp.pad(xk, ((0, Bp - B), (0, 0)))

    # Small resident operands: zero-pad to lane-dense widths, cast to bf16.
    w1p = jnp.pad(w1, ((0, 0), (0, HIDDEN_PAD - HIDDEN))).astype(jnp.bfloat16)
    b1p = jnp.pad(b1, ((0, 0), (0, HIDDEN_PAD - HIDDEN))).astype(jnp.float32)
    w2p = jnp.pad(w2, ((0, HIDDEN_PAD - HIDDEN), (0, ACTION_PAD - A))).astype(jnp.bfloat16)
    b2p = jnp.pad(b2, ((0, 0), (0, ACTION_PAD - A))).astype(jnp.float32)

    est = _vmem_estimate(TB, K, x_bytes, out_bytes)
    vmem_limit = int(min(56 * 2**20, max(32 * 2**20, int(est * 1.3))))

    cost = pl.CostEstimate(
        flops=2 * Bp * (K * HIDDEN_PAD + HIDDEN_PAD * ACTION_PAD),
        transcendentals=Bp * ACTION_PAD,
        bytes_accessed=int(Bp * K * x_bytes
                           + w1p.size * 2 + w2p.size * 2
                           + b1p.size * 4 + b2p.size * 4
                           + Bp * ACTION_PAD * out_bytes),
    )

    out = pl.pallas_call(
        _mlp_kernel,
        out_shape=jax.ShapeDtypeStruct((Bp, ACTION_PAD), out_dtype),
        grid=(Bp // TB,),
        in_specs=[
            pl.BlockSpec((TB, K), lambda i: (i, 0)),                        # x tile (pipelined)
            _resident_spec((K, HIDDEN_PAD), single_buffer_weights),         # w1 resident
            _resident_spec((1, HIDDEN_PAD), single_buffer_weights),         # b1 resident
            _resident_spec((HIDDEN_PAD, ACTION_PAD), single_buffer_weights),  # w2 resident
            _resident_spec((1, ACTION_PAD), single_buffer_weights),         # b2 resident
        ],
        out_specs=pl.BlockSpec((TB, ACTION_PAD), lambda i: (i, 0)),
        compiler_params=pltpu.CompilerParams(
            dimension_semantics=("parallel",),
            vmem_limit_bytes=vmem_limit,
        ),
        cost_estimate=cost,
    )(xk, w1p, b1p, w2p, b2p)

    # Drop batch padding and zero-padded action columns.
    return out[:B, :A]


def network_forward(x, w1, b1, w2, b2, *, block_batch=512, out_dtype=jnp.bfloat16):
    """x: (B, input_size); w1: (input_size, 200); b1: (1, 200);
    w2: (200, action_size); b2: (1, action_size).
    Returns (B, action_size) in `out_dtype` (bf16 by default; pass
    jnp.float32 for the exact PyTorch output dtype)."""
    # v5e: keep the x DMA stream at 2 B/elem (pre-cast f32 -> bf16 there);
    # v6e/v7x: HBM-bound, so stream x in its native dtype and cast in-kernel.
    precast = (x.dtype != jnp.bfloat16) and _is_v5e()
    try:
        return _forward(x, w1, b1, w2, b2, block_batch=block_batch,
                        out_dtype=out_dtype, single_buffer_weights=True,
                        precast_x_bf16=precast)
    except Exception:
        # Fallback for JAX builds that reject single-buffered BlockSpecs.
        return _forward(x, w1, b1, w2, b2, block_batch=block_batch,
                        out_dtype=out_dtype, single_buffer_weights=False,
                        precast_x_bf16=precast)


def init_params(key, input_size, action_size, hidden=HIDDEN):
    """Deterministic init mimicking PyTorch nn.Linear default (U[-1/sqrt(fan_in), +])."""
    k1, k2, k3, k4 = jax.random.split(key, 4)
    bound1 = 1.0 / jnp.sqrt(jnp.float32(input_size))
    bound2 = 1.0 / jnp.sqrt(jnp.float32(hidden))
    # Stored as (in, out) == transpose of PyTorch's (out, in) weight.
    w1 = jax.random.uniform(k1, (input_size, hidden), jnp.float32, -bound1, bound1)
    b1 = jax.random.uniform(k2, (1, hidden), jnp.float32, -bound1, bound1)
    w2 = jax.random.uniform(k3, (hidden, action_size), jnp.float32, -bound2, bound2)
    b2 = jax.random.uniform(k4, (1, action_size), jnp.float32, -bound2, bound2)
    return w1, b1, w2, b2


def reference_forward(x, w1, b1, w2, b2):
    h = jnp.maximum(x @ w1 + b1, 0.0)
    return jax.nn.sigmoid(h @ w2 + b2)


if __name__ == "__main__":
    batch = 8
    input_size = 32      # small stand-in for pong's 80*80 flattened frame diff
    action_size = 2
    key = jax.random.PRNGKey(0)
    kx, kp = jax.random.split(key)

    x = jax.random.normal(kx, (batch, input_size), dtype=jnp.float32)
    w1, b1, w2, b2 = init_params(kp, input_size, action_size)

    out = network_forward(x, w1, b1, w2, b2)
    out = jax.block_until_ready(out)

    ref = reference_forward(x, w1, b1, w2, b2)
    assert out.shape == (batch, action_size)
    # bf16 MXU inputs + bf16 output -> loosen tolerance vs the pure-f32 reference.
    assert jnp.max(jnp.abs(out.astype(jnp.float32) - ref)) < 1e-2, "mismatch vs reference"

    print("KERNEL_OK")
</pallas_src>

<mosaic_0001>
module attributes {stable_mosaic.version = 11 : i64} {
  func.func @_mlp_kernel(%arg0: i32, %arg1: memref<8x32xf32, #tpu.memory_space<vmem>>, %arg2: memref<32x256xbf16, #tpu.memory_space<vmem>>, %arg3: memref<1x256xf32, #tpu.memory_space<vmem>>, %arg4: memref<256x128xbf16, #tpu.memory_space<vmem>>, %arg5: memref<1x128xf32, #tpu.memory_space<vmem>>, %arg6: memref<8x128xbf16, #tpu.memory_space<vmem>>) attributes {dimension_semantics = [#tpu.dimension_semantics<parallel>], iteration_bounds = array<i64: 1>, scalar_prefetch = 0 : i64, scratch_operands = 0 : i64, tpu.core_type = #tpu.core_type<tc>, window_params = [{transform_indices = @transform_0, window_bounds = array<i64: 8, 32>}, {pipeline_mode = #tpu.pipeline_mode<synchronous>, transform_indices = @transform_1, window_bounds = array<i64: 32, 256>}, {pipeline_mode = #tpu.pipeline_mode<synchronous>, transform_indices = @transform_2, window_bounds = array<i64: 1, 256>}, {pipeline_mode = #tpu.pipeline_mode<synchronous>, transform_indices = @transform_3, window_bounds = array<i64: 256, 128>}, {pipeline_mode = #tpu.pipeline_mode<synchronous>, transform_indices = @transform_4, window_bounds = array<i64: 1, 128>}, {transform_indices = @transform_5, window_bounds = array<i64: 8, 128>}]} {
    %c0 = arith.constant 0 : index
    %c0_0 = arith.constant 0 : index
    %0 = vector.load %arg1[%c0, %c0_0] : memref<8x32xf32, #tpu.memory_space<vmem>>, vector<8x32xf32>
    %1 = arith.truncf %0 : vector<8x32xf32> to vector<8x32xbf16>
    %c0_1 = arith.constant 0 : index
    %c0_2 = arith.constant 0 : index
    %2 = vector.load %arg2[%c0_1, %c0_2] : memref<32x256xbf16, #tpu.memory_space<vmem>>, vector<32x256xbf16>
    %cst = arith.constant dense<0.000000e+00> : vector<8x256xf32>
    %3 = tpu.matmul %1, %2, %cst {dimension_numbers = #tpu.dot_dimension_numbers<[1], [0], [0], [1], [0, 0, 1, 1], [], []>} : vector<8x32xbf16>, vector<32x256xbf16>, vector<8x256xf32> -> vector<8x256xf32>
    %c0_3 = arith.constant 0 : index
    %c0_4 = arith.constant 0 : index
    %4 = vector.load %arg3[%c0_3, %c0_4] : memref<1x256xf32, #tpu.memory_space<vmem>>, vector<1x256xf32>
    %5 = vector.broadcast %4 : vector<1x256xf32> to vector<8x256xf32>
    %6 = arith.addf %3, %5 : vector<8x256xf32>
    %cst_5 = arith.constant 0.000000e+00 : f32
    %7 = vector.broadcast %cst_5 : f32 to vector<8x256xf32>
    %8 = arith.maximumf %6, %7 : vector<8x256xf32>
    %9 = arith.truncf %8 : vector<8x256xf32> to vector<8x256xbf16>
    %c0_6 = arith.constant 0 : index
    %c0_7 = arith.constant 0 : index
    %10 = vector.load %arg4[%c0_6, %c0_7] : memref<256x128xbf16, #tpu.memory_space<vmem>>, vector<256x128xbf16>
    %cst_8 = arith.constant dense<0.000000e+00> : vector<8x128xf32>
    %11 = tpu.matmul %9, %10, %cst_8 {dimension_numbers = #tpu.dot_dimension_numbers<[1], [0], [0], [1], [0, 0, 1, 1], [], []>} : vector<8x256xbf16>, vector<256x128xbf16>, vector<8x128xf32> -> vector<8x128xf32>
    %c0_9 = arith.constant 0 : index
    %c0_10 = arith.constant 0 : index
    %12 = vector.load %arg5[%c0_9, %c0_10] : memref<1x128xf32, #tpu.memory_space<vmem>>, vector<1x128xf32>
    %13 = vector.broadcast %12 : vector<1x128xf32> to vector<8x128xf32>
    %14 = arith.addf %11, %13 : vector<8x128xf32>
    %15 = arith.negf %14 : vector<8x128xf32>
    %16 = math.exp %15 : vector<8x128xf32>
    %cst_11 = arith.constant 1.000000e+00 : f32
    %17 = vector.broadcast %cst_11 : f32 to vector<8x128xf32>
    %18 = arith.addf %17, %16 : vector<8x128xf32>
    %19 = arith.divf %17, %18 : vector<8x128xf32>
    %20 = arith.truncf %19 : vector<8x128xf32> to vector<8x128xbf16>
    %c0_12 = arith.constant 0 : index
    %c0_13 = arith.constant 0 : index
    %21 = vector.load %arg6[%c0_12, %c0_13] : memref<8x128xbf16, #tpu.memory_space<vmem>>, vector<8x128xbf16>
    tpu.vector_store %arg6[%c0_12, %c0_13], %20 {strides = array<i32>} : memref<8x128xbf16, #tpu.memory_space<vmem>>, vector<8x128xbf16>,
    return
  }
  func.func @transform_0(%arg0: i32) -> (i32, i32) {
    %c0_i32 = arith.constant 0 : i32
    %c0_i32_0 = arith.constant 0 : i32
    return %arg0, %c0_i32 : i32, i32
  }
  func.func @transform_1(%arg0: i32) -> (i32, i32) {
    %c0_i32 = arith.constant 0 : i32
    %c0_i32_0 = arith.constant 0 : i32
    %c0_i32_1 = arith.constant 0 : i32
    return %c0_i32, %c0_i32_0 : i32, i32
  }
  func.func @transform_2(%arg0: i32) -> (i32, i32) {
    %c0_i32 = arith.constant 0 : i32
    %c0_i32_0 = arith.constant 0 : i32
    %c0_i32_1 = arith.constant 0 : i32
    return %c0_i32, %c0_i32_0 : i32, i32
  }
  func.func @transform_3(%arg0: i32) -> (i32, i32) {
    %c0_i32 = arith.constant 0 : i32
    %c0_i32_0 = arith.constant 0 : i32
    %c0_i32_1 = arith.constant 0 : i32
    return %c0_i32, %c0_i32_0 : i32, i32
  }
  func.func @transform_4(%arg0: i32) -> (i32, i32) {
    %c0_i32 = arith.constant 0 : i32
    %c0_i32_0 = arith.constant 0 : i32
    %c0_i32_1 = arith.constant 0 : i32
    return %c0_i32, %c0_i32_0 : i32, i32
  }
  func.func @transform_5(%arg0: i32) -> (i32, i32) {
    %c0_i32 = arith.constant 0 : i32
    %c0_i32_0 = arith.constant 0 : i32
    return %arg0, %c0_i32 : i32, i32
  }
}

module attributes {stable_mosaic.version = 11 : i64} {
  func.func @_mlp_kernel(%arg0: i32, %arg1: memref<8x32xf32, #tpu.memory_space<vmem>>, %arg2: memref<32x256xbf16, #tpu.memory_space<vmem>>, %arg3: memref<1x256xf32, #tpu.memory_space<vmem>>, %arg4: memref<256x128xbf16, #tpu.memory_space<vmem>>, %arg5: memref<1x128xf32, #tpu.memory_space<vmem>>, %arg6: memref<8x128xbf16, #tpu.memory_space<vmem>>) attributes {dimension_semantics = [#tpu.dimension_semantics<parallel>], iteration_bounds = array<i64: 1>, scalar_prefetch = 0 : i64, scratch_operands = 0 : i64, tpu.core_type = #tpu.core_type<tc>, window_params = [{transform_indices = @transform_0, window_bounds = array<i64: 8, 32>}, {pipeline_mode = #tpu.pipeline_mode<synchronous>, transform_indices = @transform_1, window_bounds = array<i64: 32, 256>}, {pipeline_mode = #tpu.pipeline_mode<synchronous>, transform_indices = @transform_2, window_bounds = array<i64: 1, 256>}, {pipeline_mode = #tpu.pipeline_mode<synchronous>, transform_indices = @transform_3, window_bounds = array<i64: 256, 128>}, {pipeline_mode = #tpu.pipeline_mode<synchronous>, transform_indices = @transform_4, window_bounds = array<i64: 1, 128>}, {transform_indices = @transform_5, window_bounds = array<i64: 8, 128>}]} {
    %c0 = arith.constant 0 : index
    %c0_0 = arith.constant 0 : index
    %0 = vector.load %arg1[%c0, %c0_0] : memref<8x32xf32, #tpu.memory_space<vmem>>, vector<8x32xf32>
    %1 = arith.truncf %0 : vector<8x32xf32> to vector<8x32xbf16>
    %c0_1 = arith.constant 0 : index
    %c0_2 = arith.constant 0 : index
    %2 = vector.load %arg2[%c0_1, %c0_2] : memref<32x256xbf16, #tpu.memory_space<vmem>>, vector<32x256xbf16>
    %cst = arith.constant dense<0.000000e+00> : vector<8x256xf32>
    %3 = tpu.matmul %1, %2, %cst {dimension_numbers = #tpu.dot_dimension_numbers<[1], [0], [0], [1], [0, 0, 1, 1], [], []>} : vector<8x32xbf16>, vector<32x256xbf16>, vector<8x256xf32> -> vector<8x256xf32>
    %c0_3 = arith.constant 0 : index
    %c0_4 = arith.constant 0 : index
    %4 = vector.load %arg3[%c0_3, %c0_4] : memref<1x256xf32, #tpu.memory_space<vmem>>, vector<1x256xf32>
    %5 = vector.broadcast %4 : vector<1x256xf32> to vector<8x256xf32>
    %6 = arith.addf %3, %5 : vector<8x256xf32>
    %cst_5 = arith.constant 0.000000e+00 : f32
    %7 = vector.broadcast %cst_5 : f32 to vector<8x256xf32>
    %8 = arith.maximumf %6, %7 : vector<8x256xf32>
    %9 = arith.truncf %8 : vector<8x256xf32> to vector<8x256xbf16>
    %c0_6 = arith.constant 0 : index
    %c0_7 = arith.constant 0 : index
    %10 = vector.load %arg4[%c0_6, %c0_7] : memref<256x128xbf16, #tpu.memory_space<vmem>>, vector<256x128xbf16>
    %cst_8 = arith.constant dense<0.000000e+00> : vector<8x128xf32>
    %11 = tpu.matmul %9, %10, %cst_8 {dimension_numbers = #tpu.dot_dimension_numbers<[1], [0], [0], [1], [0, 0, 1, 1], [], []>} : vector<8x256xbf16>, vector<256x128xbf16>, vector<8x128xf32> -> vector<8x128xf32>
    %c0_9 = arith.constant 0 : index
    %c0_10 = arith.constant 0 : index
    %12 = vector.load %arg5[%c0_9, %c0_10] : memref<1x128xf32, #tpu.memory_space<vmem>>, vector<1x128xf32>
    %13 = vector.broadcast %12 : vector<1x128xf32> to vector<8x128xf32>
    %14 = arith.addf %11, %13 : vector<8x128xf32>
    %15 = arith.negf %14 : vector<8x128xf32>
    %16 = math.exp %15 : vector<8x128xf32>
    %cst_11 = arith.constant 1.000000e+00 : f32
    %17 = vector.broadcast %cst_11 : f32 to vector<8x128xf32>
    %18 = arith.addf %17, %16 : vector<8x128xf32>
    %19 = arith.divf %17, %18 : vector<8x128xf32>
    %20 = arith.truncf %19 : vector<8x128xf32> to vector<8x128xbf16>
    %c0_12 = arith.constant 0 : index
    %c0_13 = arith.constant 0 : index
    %21 = vector.load %arg6[%c0_12, %c0_13] : memref<8x128xbf16, #tpu.memory_space<vmem>>, vector<8x128xbf16>
    tpu.vector_store %arg6[%c0_12, %c0_13], %20 {strides = array<i32>} : memref<8x128xbf16, #tpu.memory_space<vmem>>, vector<8x128xbf16>,
    return
  }
  func.func @transform_0(%arg0: i32) -> (i32, i32) {
    %c0_i32 = arith.constant 0 : i32
    %c0_i32_0 = arith.constant 0 : i32
    return %arg0, %c0_i32 : i32, i32
  }
  func.func @transform_1(%arg0: i32) -> (i32, i32) {
    %c0_i32 = arith.constant 0 : i32
    %c0_i32_0 = arith.constant 0 : i32
    %c0_i32_1 = arith.constant 0 : i32
    return %c0_i32, %c0_i32_0 : i32, i32
  }
  func.func @transform_2(%arg0: i32) -> (i32, i32) {
    %c0_i32 = arith.constant 0 : i32
    %c0_i32_0 = arith.constant 0 : i32
    %c0_i32_1 = arith.constant 0 : i32
    return %c0_i32, %c0_i32_0 : i32, i32
  }
  func.func @transform_3(%arg0: i32) -> (i32, i32) {
    %c0_i32 = arith.constant 0 : i32
    %c0_i32_0 = arith.constant 0 : i32
    %c0_i32_1 = arith.constant 0 : i32
    return %c0_i32, %c0_i32_0 : i32, i32
  }
  func.func @transform_4(%arg0: i32) -> (i32, i32) {
    %c0_i32 = arith.constant 0 : i32
    %c0_i32_0 = arith.constant 0 : i32
    %c0_i32_1 = arith.constant 0 : i32
    return %c0_i32, %c0_i32_0 : i32, i32
  }
  func.func @transform_5(%arg0: i32) -> (i32, i32) {
    %c0_i32 = arith.constant 0 : i32
    %c0_i32_0 = arith.constant 0 : i32
    return %arg0, %c0_i32 : i32, i32
  }
}

</mosaic_0001>

<bundles_post_ra>
// kernel: _forward.1
= control target key start
LH: loop header
LB: loop body
LE: loop exit
PB: predicated region body
PF: predicated region fallthrough
CT: control target
= control target key end

     0   :  { %vm53_vm0 = vcmask 261120   ;;  %s492_s1 = inlined_call_operand.vmem [shape: bf16[32,256], index: 1, kind: input, shape index: {}]   ;;  %s493_s0 = inlined_call_operand.vmem [shape: f32[8,32], index: 0, kind: input, shape index: {}]   ;;  %s494_s3 = inlined_call_operand.vmem [shape: bf16[256,128], index: 3, kind: input, shape index: {}]   ;;  %s495_s4 = inlined_call_operand.vmem [shape: f32[1,128], index: 4, kind: input, shape index: {}]   ;;  %s496_s2 = inlined_call_operand.vmem [shape: f32[1,256], index: 2, kind: input, shape index: {}]   ;;  %s497_s5 = inlined_call_operand.vmem [shape: bf16[8,128], index: 5, kind: output, shape index: {}]  }
   0x1   :  { %v280_v0 = vld [vmem:[%s492_s1 + $0x10] sm:$0xf]  ;;  %v356_v1 = vld [vmem:[%s492_s1 + $0x14] sm:$0xf0]  ;;  %v355_v2 = vld [vmem:[%s492_s1 + $0x14] sm:$0xf] }
   0x2   :  { %v281_v3 = vor.u32 %v356_v1, %v280_v0  ;;  %v282_v4 = vld [vmem:[%s492_s1 + $0x18] sm:$0xf0]  ;;  %v272_v5 = vld [vmem:[%s492_s1] sm:$0xf]  ;;  %v354_v6 = vld [vmem:[%s492_s1 + $0x4] sm:$0xf0] }
   0x3   :  { %v285_v7 = vor.u32 %v355_v2, %v282_v4  ;;  %v353_v8 = vld [vmem:[%s492_s1 + $0x4] sm:$0xf]  ;;  %v274_v9 = vld [vmem:[%s492_s1 + $0x8] sm:$0xf0]  ;;  %v273_v10 = vor.u32 %v354_v6, %v272_v5  ;;  %v364_v12 = vld [vmem:[%s494_s3 + $0x38] sm:$0xff] }
   0x4   :  { %63 = vmatpush.bf16.msra.mxu0 %v281_v3  ;;  %v21_v11 = vld [vmem:[%s493_s0] sm:$0xff]  ;;  %v372_v13 = vld [vmem:[%s494_s3 + $0x78] sm:$0xff]  ;;  %v277_v14 = vor.u32 %v353_v8, %v274_v9  ;;  %219 = vmatpush.bf16.msra.mxu2 %v364_v12  ;;  %v363_v15 = vld [vmem:[%s494_s3 + $0x30] sm:$0xff] }
   0x5   :  { %76 = vmatpush.bf16.msra.mxu1 %v285_v7  ;;  %232 = vmatpush.bf16.msra.mxu3 %v372_v13  ;;  %v371_v16 = vld [vmem:[%s494_s3 + $0x70] sm:$0xff]  ;;  %v22_v17 = vpack.c.bf16 %v21_v11, %v21_v11  ;;  %v362_v18 = vld [vmem:[%s494_s3 + $0x28] sm:$0xff]  ;;  %v361_v20 = vld [vmem:[%s494_s3 + $0x20] sm:$0xff] }
   0x6   :  { %v370_v19 = vld [vmem:[%s494_s3 + $0x68] sm:$0xff]  ;;  %v369_v21 = vld [vmem:[%s494_s3 + $0x60] sm:$0xff]  ;;  %v360_v22 = vld [vmem:[%s494_s3 + $0x18] sm:$0xff] }
   0x7   :  { %v368_v23 = vld [vmem:[%s494_s3 + $0x58] sm:$0xff]  ;;  %v359_v24 = vld [vmem:[%s494_s3 + $0x10] sm:$0xff]  ;;  %v358_v26 = vld [vmem:[%s494_s3 + $0x8] sm:$0xff] }
   0x8   :  { %64 = vmatpush.bf16.msra.mxu0 %v273_v10  ;;  %220 = vmatpush.bf16.msra.mxu2 %v363_v15  ;;  %v367_v25 = vld [vmem:[%s494_s3 + $0x50] sm:$0xff]  ;;  %v366_v27 = vld [vmem:[%s494_s3 + $0x48] sm:$0xff]  ;;  %v357_v28 = vld [vmem:[%s494_s3] sm:$0xff] }
   0x9   :  { %77 = vmatpush.bf16.msra.mxu1 %v277_v14  ;;  %233 = vmatpush.bf16.msra.mxu3 %v371_v16  ;;  %v365_v29 = vld [vmem:[%s494_s3 + $0x40] sm:$0xff] }
   0xa   :  { %v27_v30 = vld [vmem:[%s496_s2] sm:$0x3] }
   0xb   :  { %286 = vmatmul.msk.bf16.vlgmr.msra.gmra.mxu0 %vm53_vm0, %v22_v17  ;;  %v29_v31 = vperm.slane %v27_v30, 0  ;;  %v30_v32 = vperm.slane %v27_v30, 1  ;;  %v373_v43 = vld [vmem:[%s495_s4] ss:$0 sm:$0xff] }
   0xc   :  { %287 = vmatmul.msk.bf16.vlgmr.msra.gmra.mxu1 %vm53_vm0, %v22_v17  ;;  %221 = vmatpush.bf16.msra.mxu2 %v362_v18 }
   0xd   :  { %234 = vmatpush.bf16.msra.mxu3 %v370_v19 }
  0x10   :  { %222 = vmatpush.bf16.msra.mxu2 %v361_v20 }
  0x11   :  { %235 = vmatpush.bf16.msra.mxu3 %v369_v21 }
  0x14   :  { %223 = vmatpush.bf16.msra.mxu2 %v360_v22 }
  0x15   :  { %236 = vmatpush.bf16.msra.mxu3 %v368_v23 }
  0x18   :  { %224 = vmatpush.bf16.msra.mxu2 %v359_v24 }
  0x19   :  { %237 = vmatpush.bf16.msra.mxu3 %v367_v25 }
  0x1c   :  { %225 = vmatpush.bf16.msra.mxu2 %v358_v26 }
  0x1d   :  { %238 = vmatpush.bf16.msra.mxu3 %v366_v27 }
  0x20   :  { %226 = vmatpush.bf16.msra.mxu2 %v357_v28 }
  0x21   :  { %239 = vmatpush.bf16.msra.mxu3 %v365_v29 }
  0x88   :  { %v66_v33 = vpop.f32.mrf.mxu0 }
  0x89   :  { %v67_v34 = vadd.f32 %v66_v33, %v29_v31  ;;  %v79_v35 = vpop.f32.mrf.mxu1 }
  0x8a   :  { %v80_v36 = vadd.f32 %v79_v35, %v30_v32 }
  0x8b   :  { %v83_v37 = vmax.f32 %v67_v34, 0.0 }
  0x8c   :  { %v84_v38 = vmax.f32 %v80_v36, 0.0 }
  0x8d   :  { %v85_v39 = vpack.c.bf16 %v83_v37, %v83_v37 }
  0x8e   :  { %v86_v40 = vpack.c.bf16 %v84_v38, %v84_v38 }
  0x8f   :  { %227 = vmatmul.bf16.vlgmr.msra.gmra.mxu2 %v85_v39 }
  0x90   :  { %240 = vmatmul.bf16.vlgmr.msra.gmra.mxu3 %v86_v40  ;;  %v68_v41 = vpop.f32.mrf.mxu0 }
  0x91   :  { %v81_v42 = vpop.f32.mrf.mxu1 }
 0x112   :  { %v228_v44 = vpop.f32.mrf.mxu2 }
 0x113   :  { %v229_v45 = vadd.f32 %v373_v43, %v228_v44  ;;  %v241_v46 = vpop.f32.mrf.mxu3 }
 0x115   :  { %v242_v47 = vadd.f32 %v241_v46, %v229_v45 }
 0x117   :  { %v352_v48 = vmul.f32 -1.442695, %v242_v47 }
 0x119   :  { %374 = vpow2.f32 %v352_v48 }
 0x11a   :  { %v230_v49 = vpop.f32.mrf.mxu2 }
 0x11b   :  { %v243_v50 = vpop.f32.mrf.mxu3 }
 0x11f   :  { %v375_v51 = vpop.eup %374 }
 0x120   :  { %v248_v52 = vadd.f32 1.0, %v375_v51 }
 0x122   :  { %376 = vrcp.f32 %v248_v52  ;;  %v260_v56 = vand.u32 2147483648, %v248_v52  ;;  %v258_v58 = vand.u32 2147483647, %v248_v52  ;;  %vm254_vm2 = vweird.f32 %v248_v52 }
 0x124   :  { %v261_v60 = vor.u32 1.1754944e-38, %v260_v56  ;;  %vm259_vm4 = vcmp.eq.f32.partialorder %v258_v58, 8.507059e+37 }
 0x128   :  { %v377_v53 = vpop.eup %376 }
 0x129   :  { %v250_v54 = vmul.f32 %v377_v53, %v248_v52  ;;  %vm255_vm1 = vweird.f32 %v377_v53 }
 0x12a   :  { %vm256_vm3 = vmor %vm254_vm2, %vm255_vm1 }
 0x12b   :  { %v251_v55 = vsub.f32 1.0, %v250_v54 }
 0x12d   :  { %v252_v57 = vmul.f32 %v377_v53, %v251_v55 }
 0x12f   :  { %v253_v59 = vadd.f32 %v377_v53, %v252_v57 }
 0x131   :  { %v257_v61 = vsel %vm256_vm3, %v377_v53, %v253_v59 }
 0x132   :  { %v262_v62 = vsel %vm259_vm4, %v261_v60, %v257_v61 }
 0x133   :  { %v264_v63 = vpack.c.bf16 %v262_v62, %v262_v62 }
 0x135   :  { %265 = vst [vmem:[%s497_s5] sm:$0xf] %v264_v63 }

// kernel: _forward.1
= control target key start
LH: loop header
LB: loop body
LE: loop exit
PB: predicated region body
PF: predicated region fallthrough
CT: control target
= control target key end

     0   :  { %vm53_vm0 = vcmask 261120   ;;  %s492_s1 = inlined_call_operand.vmem [shape: bf16[32,256], index: 1, kind: input, shape index: {}]   ;;  %s493_s0 = inlined_call_operand.vmem [shape: f32[8,32], index: 0, kind: input, shape index: {}]   ;;  %s494_s3 = inlined_call_operand.vmem [shape: bf16[256,128], index: 3, kind: input, shape index: {}]   ;;  %s495_s4 = inlined_call_operand.vmem [shape: f32[1,128], index: 4, kind: input, shape index: {}]   ;;  %s496_s2 = inlined_call_operand.vmem [shape: f32[1,256], index: 2, kind: input, shape index: {}]   ;;  %s497_s5 = inlined_call_operand.vmem [shape: bf16[8,128], index: 5, kind: output, shape index: {}]  }
   0x1   :  { %v280_v0 = vld [vmem:[%s492_s1 + $0x10] sm:$0xf]  ;;  %v356_v1 = vld [vmem:[%s492_s1 + $0x14] sm:$0xf0]  ;;  %v355_v2 = vld [vmem:[%s492_s1 + $0x14] sm:$0xf] }
   0x2   :  { %v281_v3 = vor.u32 %v356_v1, %v280_v0  ;;  %v282_v4 = vld [vmem:[%s492_s1 + $0x18] sm:$0xf0]  ;;  %v272_v5 = vld [vmem:[%s492_s1] sm:$0xf]  ;;  %v354_v6 = vld [vmem:[%s492_s1 + $0x4] sm:$0xf0] }
   0x3   :  { %v285_v7 = vor.u32 %v355_v2, %v282_v4  ;;  %v353_v8 = vld [vmem:[%s492_s1 + $0x4] sm:$0xf]  ;;  %v274_v9 = vld [vmem:[%s492_s1 + $0x8] sm:$0xf0]  ;;  %v273_v10 = vor.u32 %v354_v6, %v272_v5  ;;  %v364_v12 = vld [vmem:[%s494_s3 + $0x38] sm:$0xff] }
   0x4   :  { %63 = vmatpush.bf16.msra.mxu0 %v281_v3  ;;  %v21_v11 = vld [vmem:[%s493_s0] sm:$0xff]  ;;  %v372_v13 = vld [vmem:[%s494_s3 + $0x78] sm:$0xff]  ;;  %v277_v14 = vor.u32 %v353_v8, %v274_v9  ;;  %219 = vmatpush.bf16.msra.mxu2 %v364_v12  ;;  %v363_v15 = vld [vmem:[%s494_s3 + $0x30] sm:$0xff] }
   0x5   :  { %76 = vmatpush.bf16.msra.mxu1 %v285_v7  ;;  %232 = vmatpush.bf16.msra.mxu3 %v372_v13  ;;  %v371_v16 = vld [vmem:[%s494_s3 + $0x70] sm:$0xff]  ;;  %v22_v17 = vpack.c.bf16 %v21_v11, %v21_v11  ;;  %v362_v18 = vld [vmem:[%s494_s3 + $0x28] sm:$0xff]  ;;  %v361_v20 = vld [vmem:[%s494_s3 + $0x20] sm:$0xff] }
   0x6   :  { %v370_v19 = vld [vmem:[%s494_s3 + $0x68] sm:$0xff]  ;;  %v369_v21 = vld [vmem:[%s494_s3 + $0x60] sm:$0xff]  ;;  %v360_v22 = vld [vmem:[%s494_s3 + $0x18] sm:$0xff] }
   0x7   :  { %v368_v23 = vld [vmem:[%s494_s3 + $0x58] sm:$0xff]  ;;  %v359_v24 = vld [vmem:[%s494_s3 + $0x10] sm:$0xff]  ;;  %v358_v26 = vld [vmem:[%s494_s3 + $0x8] sm:$0xff] }
   0x8   :  { %64 = vmatpush.bf16.msra.mxu0 %v273_v10  ;;  %220 = vmatpush.bf16.msra.mxu2 %v363_v15  ;;  %v367_v25 = vld [vmem:[%s494_s3 + $0x50] sm:$0xff]  ;;  %v366_v27 = vld [vmem:[%s494_s3 + $0x48] sm:$0xff]  ;;  %v357_v28 = vld [vmem:[%s494_s3] sm:$0xff] }
   0x9   :  { %77 = vmatpush.bf16.msra.mxu1 %v277_v14  ;;  %233 = vmatpush.bf16.msra.mxu3 %v371_v16  ;;  %v365_v29 = vld [vmem:[%s494_s3 + $0x40] sm:$0xff] }
   0xa   :  { %v27_v30 = vld [vmem:[%s496_s2] sm:$0x3] }
   0xb   :  { %286 = vmatmul.msk.bf16.vlgmr.msra.gmra.mxu0 %vm53_vm0, %v22_v17  ;;  %v29_v31 = vperm.slane %v27_v30, 0  ;;  %v30_v32 = vperm.slane %v27_v30, 1  ;;  %v373_v43 = vld [vmem:[%s495_s4] ss:$0 sm:$0xff] }
   0xc   :  { %287 = vmatmul.msk.bf16.vlgmr.msra.gmra.mxu1 %vm53_vm0, %v22_v17  ;;  %221 = vmatpush.bf16.msra.mxu2 %v362_v18 }
   0xd   :  { %234 = vmatpush.bf16.msra.mxu3 %v370_v19 }
  0x10   :  { %222 = vmatpush.bf16.msra.mxu2 %v361_v20 }
  0x11   :  { %235 = vmatpush.bf16.msra.mxu3 %v369_v21 }
  0x14   :  { %223 = vmatpush.bf16.msra.mxu2 %v360_v22 }
  0x15   :  { %236 = vmatpush.bf16.msra.mxu3 %v368_v23 }
  0x18   :  { %224 = vmatpush.bf16.msra.mxu2 %v359_v24 }
  0x19   :  { %237 = vmatpush.bf16.msra.mxu3 %v367_v25 }
  0x1c   :  { %225 = vmatpush.bf16.msra.mxu2 %v358_v26 }
  0x1d   :  { %238 = vmatpush.bf16.msra.mxu3 %v366_v27 }
  0x20   :  { %226 = vmatpush.bf16.msra.mxu2 %v357_v28 }
  0x21   :  { %239 = vmatpush.bf16.msra.mxu3 %v365_v29 }
  0x88   :  { %v66_v33 = vpop.f32.mrf.mxu0 }
  0x89   :  { %v67_v34 = vadd.f32 %v66_v33, %v29_v31  ;;  %v79_v35 = vpop.f32.mrf.mxu1 }
  0x8a   :  { %v80_v36 = vadd.f32 %v79_v35, %v30_v32 }
  0x8b   :  { %v83_v37 = vmax.f32 %v67_v34, 0.0 }
  0x8c   :  { %v84_v38 = vmax.f32 %v80_v36, 0.0 }
  0x8d   :  { %v85_v39 = vpack.c.bf16 %v83_v37, %v83_v37 }
  0x8e   :  { %v86_v40 = vpack.c.bf16 %v84_v38, %v84_v38 }
  0x8f   :  { %227 = vmatmul.bf16.vlgmr.msra.gmra.mxu2 %v85_v39 }
  0x90   :  { %240 = vmatmul.bf16.vlgmr.msra.gmra.mxu3 %v86_v40  ;;  %v68_v41 = vpop.f32.mrf.mxu0 }
  0x91   :  { %v81_v42 = vpop.f32.mrf.mxu1 }
 0x112   :  { %v228_v44 = vpop.f32.mrf.mxu2 }
 0x113   :  { %v229_v45 = vadd.f32 %v373_v43, %v228_v44  ;;  %v241_v46 = vpop.f32.mrf.mxu3 }
 0x115   :  { %v242_v47 = vadd.f32 %v241_v46, %v229_v45 }
 0x117   :  { %v352_v48 = vmul.f32 -1.442695, %v242_v47 }
 0x119   :  { %374 = vpow2.f32 %v352_v48 }
 0x11a   :  { %v230_v49 = vpop.f32.mrf.mxu2 }
 0x11b   :  { %v243_v50 = vpop.f32.mrf.mxu3 }
 0x11f   :  { %v375_v51 = vpop.eup %374 }
 0x120   :  { %v248_v52 = vadd.f32 1.0, %v375_v51 }
 0x122   :  { %376 = vrcp.f32 %v248_v52  ;;  %v260_v56 = vand.u32 2147483648, %v248_v52  ;;  %v258_v58 = vand.u32 2147483647, %v248_v52  ;;  %vm254_vm2 = vweird.f32 %v248_v52 }
 0x124   :  { %v261_v60 = vor.u32 1.1754944e-38, %v260_v56  ;;  %vm259_vm4 = vcmp.eq.f32.partialorder %v258_v58, 8.507059e+37 }
 0x128   :  { %v377_v53 = vpop.eup %376 }
 0x129   :  { %v250_v54 = vmul.f32 %v377_v53, %v248_v52  ;;  %vm255_vm1 = vweird.f32 %v377_v53 }
 0x12a   :  { %vm256_vm3 = vmor %vm254_vm2, %vm255_vm1 }
 0x12b   :  { %v251_v55 = vsub.f32 1.0, %v250_v54 }
 0x12d   :  { %v252_v57 = vmul.f32 %v377_v53, %v251_v55 }
 0x12f   :  { %v253_v59 = vadd.f32 %v377_v53, %v252_v57 }
 0x131   :  { %v257_v61 = vsel %vm256_vm3, %v377_v53, %v253_v59 }
 0x132   :  { %v262_v62 = vsel %vm259_vm4, %v261_v60, %v257_v61 }
 0x133   :  { %v264_v63 = vpack.c.bf16 %v262_v62, %v262_v62 }
 0x135   :  { %265 = vst [vmem:[%s497_s5] sm:$0xf] %v264_v63 }

</bundles_post_ra>
